<compile_context>
chip_gen: v7x
topology: tpu7x:2x2x1
jax: 0.10.0
libtpu: 0.0.40
codegen_flags: <defaults>
</compile_context>

<pallas_src>
import math

import jax
import jax.numpy as jnp
from jax.experimental import pallas as pl
from jax.experimental.pallas import tpu as pltpu


# ---------------------------------------------------------------------------
# Kernel
# ---------------------------------------------------------------------------
def mixfc_kernel(x_ref, w_ref, vec_ref, out_ref):
    bf16 = jnp.bfloat16
    f32 = jnp.float32

    def row(i):
        # lazy sublane-broadcast read of one [1,128] row of the vector slab
        return vec_ref[i:i + 1, :]

    def relu(v):
        return jnp.maximum(v, 0.0)

    def sigmoid(v):
        # stable logistic: one exp (EUP) + one approx reciprocal (EUP);
        # negative branch via the exact identity e/(1+e) == 1 - 1/(1+e).
        e = jnp.exp(-jnp.abs(v))
        r = pl.reciprocal(1.0 + e, approx=True)
        return jnp.where(v >= 0.0, r, 1.0 - r)

    x = x_ref[...].astype(bf16)                               # [TB, 128]

    # ---- stage 1: all six input-facing Linears as one block-diagonal matmul
    h1 = jnp.dot(x, w_ref[0:128, :], preferred_element_type=f32) + row(0)
    a1 = relu(h1 * row(1) + row(2))          # relu everywhere; bn3 folded on fc7 lanes

    # ---- stage 2: fc3/fc6 of both models + identity passthrough of fc7 lanes
    h2 = jnp.dot(a1.astype(bf16), w_ref[128:256, :],
                 preferred_element_type=f32) + row(3)
    v2 = h2 * row(4) + row(5)                # bn1 folded; identity elsewhere
    a2 = jnp.where(row(6) > 0.5, sigmoid(v2), relu(v2))

    # ---- stage 3: m1.fc5 (-> pred1) and m2.fc8 (+ bn4 + relu on its lanes)
    h3 = jnp.dot(a2.astype(bf16), w_ref[256:384, :],
                 preferred_element_type=f32) + row(7)
    v3 = h3 * row(8) + row(9)
    a3 = jnp.where(row(10) > 0.5, relu(v3), v3)

    # ---- stage 4: m2.fc5 with the 0.5*(pred1 + pred2) ensemble average folded in
    out_ref[...] = jnp.dot(a3.astype(bf16), w_ref[384:512, :],
                           preferred_element_type=f32) + row(11)


# ---------------------------------------------------------------------------
# Parameter construction (deterministic, PyTorch-default-style init)
# ---------------------------------------------------------------------------
def init_linear(key, in_f, out_f):
    k1, k2 = jax.random.split(key)
    bound = 1.0 / math.sqrt(in_f)
    w = jax.random.uniform(k1, (in_f, out_f), jnp.float32, -bound, bound)  # [in,out]
    b = jax.random.uniform(k2, (out_f,), jnp.float32, -bound, bound)
    return w, b


def init_bn(key, n, eps=1e-5):
    # eval-mode BatchNorm1d folded to per-feature scale/shift.
    k1, k2, k3, k4 = jax.random.split(key, 4)
    gamma = 1.0 + 0.1 * jax.random.normal(k1, (n,), jnp.float32)
    beta = 0.1 * jax.random.normal(k2, (n,), jnp.float32)
    mean = 0.1 * jax.random.normal(k3, (n,), jnp.float32)
    var = 1.0 + 0.1 * jax.random.uniform(k4, (n,), jnp.float32)
    scale = gamma / jnp.sqrt(var + eps)
    shift = beta - mean * scale
    return scale, shift


def make_params(key):
    ks = jax.random.split(key, 18)
    p = {}
    # ----- model 1 -----
    p["m1_w1"], p["m1_b1"] = init_linear(ks[0], 52, 32)
    p["m1_w2"], p["m1_b2"] = init_linear(ks[1], 54, 16)
    p["m1_w7"], p["m1_b7"] = init_linear(ks[2], 6, 2)
    p["m1_w3"], p["m1_b3"] = init_linear(ks[3], 32, 32)
    p["m1_w6"], p["m1_b6"] = init_linear(ks[4], 16, 16)
    p["m1_w5"], p["m1_b5"] = init_linear(ks[5], 50, 2)
    p["m1_bn1_s"], p["m1_bn1_t"] = init_bn(ks[6], 32)
    p["m1_bn3_s"], p["m1_bn3_t"] = init_bn(ks[7], 2)
    # ----- model 2 -----
    p["m2_w1"], p["m2_b1"] = init_linear(ks[8], 52, 32)
    p["m2_w2"], p["m2_b2"] = init_linear(ks[9], 54, 32)
    p["m2_w7"], p["m2_b7"] = init_linear(ks[10], 6, 2)
    p["m2_w3"], p["m2_b3"] = init_linear(ks[11], 32, 16)
    p["m2_w6"], p["m2_b6"] = init_linear(ks[12], 32, 16)
    p["m2_w8"], p["m2_b8"] = init_linear(ks[13], 34, 16)
    p["m2_w5"], p["m2_b5"] = init_linear(ks[14], 16, 2)
    p["m2_bn1_s"], p["m2_bn1_t"] = init_bn(ks[15], 16)
    p["m2_bn3_s"], p["m2_bn3_t"] = init_bn(ks[16], 2)
    p["m2_bn4_s"], p["m2_bn4_t"] = init_bn(ks[17], 16)
    return p


def pack_params(p):
    """Pack per-layer params into one bf16 weight slab + one f32 vector slab."""
    f32 = jnp.float32
    I2 = jnp.eye(2, dtype=f32)

    # stage-1 lane layout: [m1x1 0:32 | m1x2 32:48 | m1x3 48:50 |
    #                       m2y1 50:82 | m2y2 82:114 | m2y3 114:116 | pad]
    # (input rows 112:128 are zero-padded lanes of the data)
    W1 = jnp.zeros((128, 128), f32)
    W1 = W1.at[0:52, 0:32].set(p["m1_w1"])
    W1 = W1.at[52:106, 32:48].set(p["m1_w2"])
    W1 = W1.at[106:112, 48:50].set(p["m1_w7"])
    W1 = W1.at[0:52, 50:82].set(p["m2_w1"])
    W1 = W1.at[52:106, 82:114].set(p["m2_w2"])
    W1 = W1.at[106:112, 114:116].set(p["m2_w7"])

    # stage-2 lane layout: [m1.x1 0:32 | m1.x2 32:48 | m1.x3 48:50 |
    #                       m2.y1 50:66 | m2.y2 66:82 | m2.y3 82:84 | pad]
    W2 = jnp.zeros((128, 128), f32)
    W2 = W2.at[0:32, 0:32].set(p["m1_w3"])
    W2 = W2.at[32:48, 32:48].set(p["m1_w6"])
    W2 = W2.at[48:50, 48:50].set(I2)                     # passthrough m1.x3
    W2 = W2.at[50:82, 50:66].set(p["m2_w3"])
    W2 = W2.at[82:114, 66:82].set(p["m2_w6"])
    W2 = W2.at[114:116, 82:84].set(I2)                   # passthrough m2.y3

    # stage-3 lane layout: [pred1 0:2 | m2 hidden 2:18 | pad]
    W3 = jnp.zeros((128, 128), f32)
    W3 = W3.at[0:50, 0:2].set(p["m1_w5"])
    W3 = W3.at[50:84, 2:18].set(p["m2_w8"])

    # stage-4: out = 0.5*pred1 + 0.5*(hidden @ m2.fc5 + b)
    W4 = jnp.zeros((128, 128), f32)
    W4 = W4.at[0:2, 0:2].set(0.5 * I2)
    W4 = W4.at[2:18, 0:2].set(0.5 * p["m2_w5"])

    wslab = jnp.concatenate([W1, W2, W3, W4], axis=0)        # [512, 128] f32
    wslab = wslab.astype(jnp.bfloat16)                       # halve the dominant DMA

    # --- vector slab (f32): biases, folded-BN scale/shift, activation masks ---
    b1 = (jnp.zeros((128,), f32)
          .at[0:32].set(p["m1_b1"]).at[32:48].set(p["m1_b2"]).at[48:50].set(p["m1_b7"])
          .at[50:82].set(p["m2_b1"]).at[82:114].set(p["m2_b2"]).at[114:116].set(p["m2_b7"]))
    s1 = jnp.ones((128,), f32).at[48:50].set(p["m1_bn3_s"]).at[114:116].set(p["m2_bn3_s"])
    t1 = jnp.zeros((128,), f32).at[48:50].set(p["m1_bn3_t"]).at[114:116].set(p["m2_bn3_t"])

    b2 = (jnp.zeros((128,), f32)
          .at[0:32].set(p["m1_b3"]).at[32:48].set(p["m1_b6"])
          .at[50:66].set(p["m2_b3"]).at[66:82].set(p["m2_b6"]))
    s2 = jnp.ones((128,), f32).at[0:32].set(p["m1_bn1_s"]).at[50:66].set(p["m2_bn1_s"])
    t2 = jnp.zeros((128,), f32).at[0:32].set(p["m1_bn1_t"]).at[50:66].set(p["m2_bn1_t"])
    sig_mask = jnp.zeros((128,), f32).at[32:48].set(1.0).at[66:82].set(1.0)

    b3 = jnp.zeros((128,), f32).at[0:2].set(p["m1_b5"]).at[2:18].set(p["m2_b8"])
    s3 = jnp.ones((128,), f32).at[2:18].set(p["m2_bn4_s"])
    t3 = jnp.zeros((128,), f32).at[2:18].set(p["m2_bn4_t"])
    relu_mask = jnp.zeros((128,), f32).at[2:18].set(1.0)

    b4 = jnp.zeros((128,), f32).at[0:2].set(0.5 * p["m2_b5"])

    rows = jnp.stack([b1, s1, t1, b2, s2, t2, sig_mask, b3, s3, t3, relu_mask, b4], axis=0)
    vec = jnp.zeros((16, 128), f32).at[0:12, :].set(rows)
    return wslab, vec


# ---------------------------------------------------------------------------
# Wrapper
# ---------------------------------------------------------------------------
def _pad_data(data, rows):
    b, f = data.shape
    return jnp.pad(data, ((0, rows - b), (0, 128 - f)))      # lane-pad 112 -> 128


def _cost(rows):
    return pl.CostEstimate(
        flops=rows * 4 * 128 * 128 * 2,
        transcendentals=rows * 256,
        bytes_accessed=rows * 128 * 4 * 2 + 512 * 128 * 2 + 16 * 128 * 4)


def mixfc_forward(data, packed, *, tb=512):
    """data: [B, 112] f32; packed = (bf16 [512,128] weight slab, f32 [16,128] vec)."""
    wslab, vec = packed
    B = data.shape[0]

    if B <= tb:
        # tiny batch: gridless, everything resident in VMEM (one DMA each)
        Bp = max(8, ((B + 7) // 8) * 8)
        xp = _pad_data(data, Bp)
        vmem = pl.BlockSpec(memory_space=pltpu.MemorySpace.VMEM)
        out = pl.pallas_call(
            mixfc_kernel,
            out_shape=jax.ShapeDtypeStruct((Bp, 128), jnp.float32),
            in_specs=[vmem, vmem, vmem],
            out_specs=vmem,
            cost_estimate=_cost(Bp),
        )(xp, wslab, vec)
    else:
        # batched path: weights/vec DMA'd once (constant block index), data and
        # output pipelined per TB-row tile; "parallel" shards over v7x's 2 TCs.
        Bp = ((B + tb - 1) // tb) * tb
        xp = _pad_data(data, Bp)
        out = pl.pallas_call(
            mixfc_kernel,
            out_shape=jax.ShapeDtypeStruct((Bp, 128), jnp.float32),
            grid=(Bp // tb,),
            in_specs=[pl.BlockSpec((tb, 128), lambda i: (i, 0)),
                      pl.BlockSpec((512, 128), lambda i: (0, 0)),
                      pl.BlockSpec((16, 128), lambda i: (0, 0))],
            out_specs=pl.BlockSpec((tb, 128), lambda i: (i, 0)),
            compiler_params=pltpu.CompilerParams(
                dimension_semantics=("parallel",)),
            cost_estimate=_cost(Bp),
        )(xp, wslab, vec)

    return out[:B, :2]   # glue: drop batch/lane padding


# ---------------------------------------------------------------------------
# Pure-JAX reference (eval-mode semantics) for verification
# ---------------------------------------------------------------------------
def reference_forward(data, p):
    relu = lambda v: jnp.maximum(v, 0.0)
    sig = jax.nn.sigmoid
    xa, xb, xc = data[:, :52], data[:, 52:-6], data[:, -6:]

    # model 1
    x1 = relu(xa @ p["m1_w1"] + p["m1_b1"])
    x1 = relu((x1 @ p["m1_w3"] + p["m1_b3"]) * p["m1_bn1_s"] + p["m1_bn1_t"])
    x2 = relu(xb @ p["m1_w2"] + p["m1_b2"])
    x2 = sig(x2 @ p["m1_w6"] + p["m1_b6"])
    x3 = relu((xc @ p["m1_w7"] + p["m1_b7"]) * p["m1_bn3_s"] + p["m1_bn3_t"])
    pred1 = jnp.concatenate([x1, x2, x3], axis=1) @ p["m1_w5"] + p["m1_b5"]

    # model 2
    y1 = relu(xa @ p["m2_w1"] + p["m2_b1"])
    y1 = relu((y1 @ p["m2_w3"] + p["m2_b3"]) * p["m2_bn1_s"] + p["m2_bn1_t"])
    y2 = relu(xb @ p["m2_w2"] + p["m2_b2"])
    y2 = sig(y2 @ p["m2_w6"] + p["m2_b6"])
    y3 = relu((xc @ p["m2_w7"] + p["m2_b7"]) * p["m2_bn3_s"] + p["m2_bn3_t"])
    cat2 = jnp.concatenate([y1, y2, y3], axis=1)
    h = relu((cat2 @ p["m2_w8"] + p["m2_b8"]) * p["m2_bn4_s"] + p["m2_bn4_t"])
    pred2 = h @ p["m2_w5"] + p["m2_b5"]

    return (pred1 + pred2) / 2.0


if __name__ == "__main__":
    key = jax.random.PRNGKey(0)
    k_data, k_params = jax.random.split(key)

    params = make_params(k_params)
    packed = pack_params(params)

    # tolerance reflects bf16 weight storage + default-precision (bf16) MXU
    # operands; any layout/wiring error would show up as O(0.1-1) differences.
    TOL = 3e-2

    # --- small batch: gridless resident path
    B = 8
    data = jax.random.normal(k_data, (B, 112), dtype=jnp.float32)
    out = jax.block_until_ready(mixfc_forward(data, packed))
    ref = reference_forward(data, params)
    assert out.shape == (B, 2)
    assert jnp.allclose(out, ref, rtol=TOL, atol=TOL), "small-batch mismatch vs reference"

    # --- large batch: batch-grid path (weights resident, data pipelined,
    #     grid sharded across TensorCores where available)
    B2 = 2048
    data2 = jax.random.normal(jax.random.PRNGKey(1), (B2, 112), dtype=jnp.float32)
    out2 = jax.block_until_ready(mixfc_forward(data2, packed, tb=512))
    ref2 = reference_forward(data2, params)
    assert out2.shape == (B2, 2)
    assert jnp.allclose(out2, ref2, rtol=TOL, atol=TOL), "batched mismatch vs reference"

    print("KERNEL_OK")
</pallas_src>

<mosaic_0001>
module attributes {stable_mosaic.version = 11 : i64} {
  func.func @mixfc_kernel(%arg0: memref<8x128xf32, #tpu.memory_space<vmem>>, %arg1: memref<512x128xbf16, #tpu.memory_space<vmem>>, %arg2: memref<16x128xf32, #tpu.memory_space<vmem>>, %arg3: memref<8x128xf32, #tpu.memory_space<vmem>>) attributes {dimension_semantics = [], scalar_prefetch = 0 : i64, scratch_operands = 0 : i64, tpu.core_type = #tpu.core_type<tc>} {
    %c0 = arith.constant 0 : index
    %c0_0 = arith.constant 0 : index
    %0 = vector.load %arg0[%c0, %c0_0] : memref<8x128xf32, #tpu.memory_space<vmem>>, vector<8x128xf32>
    %1 = arith.truncf %0 : vector<8x128xf32> to vector<8x128xbf16>
    %c0_1 = arith.constant 0 : index
    %c0_2 = arith.constant 0 : index
    %2 = vector.load %arg1[%c0_1, %c0_2] : memref<512x128xbf16, #tpu.memory_space<vmem>>, vector<128x128xbf16>
    %cst = arith.constant dense<0.000000e+00> : vector<8x128xf32>
    %3 = tpu.matmul %1, %2, %cst {dimension_numbers = #tpu.dot_dimension_numbers<[1], [0], [0], [1], [0, 0, 1, 1], [], []>} : vector<8x128xbf16>, vector<128x128xbf16>, vector<8x128xf32> -> vector<8x128xf32>
    %c0_3 = arith.constant 0 : index
    %c0_4 = arith.constant 0 : index
    %4 = vector.load %arg2[%c0_3, %c0_4] : memref<16x128xf32, #tpu.memory_space<vmem>>, vector<1x128xf32>
    %5 = vector.broadcast %4 : vector<1x128xf32> to vector<8x128xf32>
    %6 = arith.addf %3, %5 : vector<8x128xf32>
    %c1 = arith.constant 1 : index
    %c0_5 = arith.constant 0 : index
    %7 = vector.load %arg2[%c1, %c0_5] : memref<16x128xf32, #tpu.memory_space<vmem>>, vector<1x128xf32>
    %8 = vector.broadcast %7 : vector<1x128xf32> to vector<8x128xf32>
    %9 = arith.mulf %6, %8 : vector<8x128xf32>
    %c2 = arith.constant 2 : index
    %c0_6 = arith.constant 0 : index
    %10 = vector.load %arg2[%c2, %c0_6] : memref<16x128xf32, #tpu.memory_space<vmem>>, vector<1x128xf32>
    %11 = vector.broadcast %10 : vector<1x128xf32> to vector<8x128xf32>
    %12 = arith.addf %9, %11 : vector<8x128xf32>
    %cst_7 = arith.constant 0.000000e+00 : f32
    %13 = vector.broadcast %cst_7 : f32 to vector<8x128xf32>
    %14 = arith.maximumf %12, %13 : vector<8x128xf32>
    %15 = arith.truncf %14 : vector<8x128xf32> to vector<8x128xbf16>
    %c128 = arith.constant 128 : index
    %c0_8 = arith.constant 0 : index
    %16 = vector.load %arg1[%c128, %c0_8] : memref<512x128xbf16, #tpu.memory_space<vmem>>, vector<128x128xbf16>
    %cst_9 = arith.constant dense<0.000000e+00> : vector<8x128xf32>
    %17 = tpu.matmul %15, %16, %cst_9 {dimension_numbers = #tpu.dot_dimension_numbers<[1], [0], [0], [1], [0, 0, 1, 1], [], []>} : vector<8x128xbf16>, vector<128x128xbf16>, vector<8x128xf32> -> vector<8x128xf32>
    %c3 = arith.constant 3 : index
    %c0_10 = arith.constant 0 : index
    %18 = vector.load %arg2[%c3, %c0_10] : memref<16x128xf32, #tpu.memory_space<vmem>>, vector<1x128xf32>
    %19 = vector.broadcast %18 : vector<1x128xf32> to vector<8x128xf32>
    %20 = arith.addf %17, %19 : vector<8x128xf32>
    %c4 = arith.constant 4 : index
    %c0_11 = arith.constant 0 : index
    %21 = vector.load %arg2[%c4, %c0_11] : memref<16x128xf32, #tpu.memory_space<vmem>>, vector<1x128xf32>
    %22 = vector.broadcast %21 : vector<1x128xf32> to vector<8x128xf32>
    %23 = arith.mulf %20, %22 : vector<8x128xf32>
    %c5 = arith.constant 5 : index
    %c0_12 = arith.constant 0 : index
    %24 = vector.load %arg2[%c5, %c0_12] : memref<16x128xf32, #tpu.memory_space<vmem>>, vector<1x128xf32>
    %25 = vector.broadcast %24 : vector<1x128xf32> to vector<8x128xf32>
    %26 = arith.addf %23, %25 : vector<8x128xf32>
    %c6 = arith.constant 6 : index
    %c0_13 = arith.constant 0 : index
    %27 = vector.load %arg2[%c6, %c0_13] : memref<16x128xf32, #tpu.memory_space<vmem>>, vector<1x128xf32>
    %cst_14 = arith.constant 5.000000e-01 : f32
    %28 = vector.broadcast %cst_14 : f32 to vector<1x128xf32>
    %29 = arith.cmpf ogt, %27, %28 : vector<1x128xf32>
    %30 = math.absf %26 : vector<8x128xf32>
    %cst_15 = arith.constant 0.000000e+00 : f32
    %31 = vector.broadcast %cst_15 : f32 to vector<8x128xf32>
    %32 = arith.subf %31, %30 : vector<8x128xf32>
    %33 = math.exp %32 : vector<8x128xf32>
    %cst_16 = arith.constant 1.000000e+00 : f32
    %34 = vector.broadcast %cst_16 : f32 to vector<8x128xf32>
    %35 = arith.addf %34, %33 : vector<8x128xf32>
    %36 = tpu.reciprocal %35 {approx = true} : vector<8x128xf32> -> vector<8x128xf32>
    %cst_17 = arith.constant 0.000000e+00 : f32
    %37 = vector.broadcast %cst_17 : f32 to vector<8x128xf32>
    %38 = arith.cmpf oge, %26, %37 : vector<8x128xf32>
    %cst_18 = arith.constant 1.000000e+00 : f32
    %39 = vector.broadcast %cst_18 : f32 to vector<8x128xf32>
    %40 = arith.subf %39, %36 : vector<8x128xf32>
    %41 = arith.select %38, %36, %40 : vector<8x128xi1>, vector<8x128xf32>
    %cst_19 = arith.constant 0.000000e+00 : f32
    %42 = vector.broadcast %cst_19 : f32 to vector<8x128xf32>
    %43 = arith.maximumf %26, %42 : vector<8x128xf32>
    %44 = vector.shape_cast %29 : vector<1x128xi1> to vector<1x128xi1>
    %45 = vector.broadcast %44 : vector<1x128xi1> to vector<8x128xi1>
    %46 = arith.select %45, %41, %43 : vector<8x128xi1>, vector<8x128xf32>
    %47 = arith.truncf %46 : vector<8x128xf32> to vector<8x128xbf16>
    %c256 = arith.constant 256 : index
    %c0_20 = arith.constant 0 : index
    %48 = vector.load %arg1[%c256, %c0_20] : memref<512x128xbf16, #tpu.memory_space<vmem>>, vector<128x128xbf16>
    %cst_21 = arith.constant dense<0.000000e+00> : vector<8x128xf32>
    %49 = tpu.matmul %47, %48, %cst_21 {dimension_numbers = #tpu.dot_dimension_numbers<[1], [0], [0], [1], [0, 0, 1, 1], [], []>} : vector<8x128xbf16>, vector<128x128xbf16>, vector<8x128xf32> -> vector<8x128xf32>
    %c7 = arith.constant 7 : index
    %c0_22 = arith.constant 0 : index
    %50 = vector.load %arg2[%c7, %c0_22] : memref<16x128xf32, #tpu.memory_space<vmem>>, vector<1x128xf32>
    %51 = vector.broadcast %50 : vector<1x128xf32> to vector<8x128xf32>
    %52 = arith.addf %49, %51 : vector<8x128xf32>
    %c8 = arith.constant 8 : index
    %c0_23 = arith.constant 0 : index
    %53 = vector.load %arg2[%c8, %c0_23] : memref<16x128xf32, #tpu.memory_space<vmem>>, vector<1x128xf32>
    %54 = vector.broadcast %53 : vector<1x128xf32> to vector<8x128xf32>
    %55 = arith.mulf %52, %54 : vector<8x128xf32>
    %c9 = arith.constant 9 : index
    %c0_24 = arith.constant 0 : index
    %56 = vector.load %arg2[%c9, %c0_24] : memref<16x128xf32, #tpu.memory_space<vmem>>, vector<1x128xf32>
    %57 = vector.broadcast %56 : vector<1x128xf32> to vector<8x128xf32>
    %58 = arith.addf %55, %57 : vector<8x128xf32>
    %c10 = arith.constant 10 : index
    %c0_25 = arith.constant 0 : index
    %59 = vector.load %arg2[%c10, %c0_25] : memref<16x128xf32, #tpu.memory_space<vmem>>, vector<1x128xf32>
    %cst_26 = arith.constant 5.000000e-01 : f32
    %60 = vector.broadcast %cst_26 : f32 to vector<1x128xf32>
    %61 = arith.cmpf ogt, %59, %60 : vector<1x128xf32>
    %cst_27 = arith.constant 0.000000e+00 : f32
    %62 = vector.broadcast %cst_27 : f32 to vector<8x128xf32>
    %63 = arith.maximumf %58, %62 : vector<8x128xf32>
    %64 = vector.shape_cast %61 : vector<1x128xi1> to vector<1x128xi1>
    %65 = vector.broadcast %64 : vector<1x128xi1> to vector<8x128xi1>
    %66 = arith.select %65, %63, %58 : vector<8x128xi1>, vector<8x128xf32>
    %67 = arith.truncf %66 : vector<8x128xf32> to vector<8x128xbf16>
    %c384 = arith.constant 384 : index
    %c0_28 = arith.constant 0 : index
    %68 = vector.load %arg1[%c384, %c0_28] : memref<512x128xbf16, #tpu.memory_space<vmem>>, vector<128x128xbf16>
    %cst_29 = arith.constant dense<0.000000e+00> : vector<8x128xf32>
    %69 = tpu.matmul %67, %68, %cst_29 {dimension_numbers = #tpu.dot_dimension_numbers<[1], [0], [0], [1], [0, 0, 1, 1], [], []>} : vector<8x128xbf16>, vector<128x128xbf16>, vector<8x128xf32> -> vector<8x128xf32>
    %c11 = arith.constant 11 : index
    %c0_30 = arith.constant 0 : index
    %70 = vector.load %arg2[%c11, %c0_30] : memref<16x128xf32, #tpu.memory_space<vmem>>, vector<1x128xf32>
    %71 = vector.broadcast %70 : vector<1x128xf32> to vector<8x128xf32>
    %72 = arith.addf %69, %71 : vector<8x128xf32>
    %c0_31 = arith.constant 0 : index
    %c0_32 = arith.constant 0 : index
    %73 = vector.load %arg3[%c0_31, %c0_32] : memref<8x128xf32, #tpu.memory_space<vmem>>, vector<8x128xf32>
    tpu.vector_store %arg3[%c0_31, %c0_32], %72 {strides = array<i32>} : memref<8x128xf32, #tpu.memory_space<vmem>>, vector<8x128xf32>,
    return
  }
}

</mosaic_0001>

<bundles_post_ra>
// kernel: tpu_custom_call.1
= control target key start
LH: loop header
LB: loop body
LE: loop exit
PB: predicated region body
PF: predicated region fallthrough
CT: control target
= control target key end

     0   :  { %8 = vsyncpa [#allocation3], 0  ;;  %s997_s0 = inlined_call_operand.hbm [shape: f32[8,128], index: 0, kind: input, shape index: {}]   ;;  %s998_s1 = inlined_call_operand.hbm [shape: bf16[512,128], index: 1, kind: input, shape index: {}]   ;;  %s999_s2 = inlined_call_operand.hbm [shape: f32[16,128], index: 2, kind: input, shape index: {}]   ;;  %s1000_s3 = inlined_call_operand.hbm [shape: f32[8,128], index: 3, kind: output, shape index: {}]  }
   0x1   :  { %9 = vsyncpa [#allocation6], 0 }
   0x2   :  { %10 = vsyncpa [#allocation4], 0  ;;  %s878_s12 = smov [#allocation5]   ;;  %s784_s16 = scalar_lea.hbm %s998_s1, 4096 }
   0x3   :  { %s26_s13 = sshll.u32 %s878_s12, 4  ;;  %p785_p0 = scmp.ne.s32.totalorder %s998_s1, %s784_s16  ;;  %s27_s13 = int_to_ptr.vmem [resolvable:$true] %s26_s13 }
   0x4   :  { %p788_p1 = scmp.lt.u32.totalorder %s784_s16, %s998_s1 }
   0x6   :  { %p790_p2 = pnand %p788_p1, %p785_p0 }
   0x8   :  { %793 = shalt.err (!%p790_p2)
}
   0x9   :  { %s794_s21 = scalar_lea.vmem %s27_s13, 4096  ;;  %p799_p4 = scmp.lt.s32.totalorder %s27_s13, %s27_s13 }
   0xa   :  { %p795_p3 = scmp.ne.s32.totalorder %s27_s13, %s794_s21  ;;  %p800_p5 = scmp.lt.s32.totalorder %s794_s21, %s794_s21 }
   0xc   :  { %p801_p6 = por %p800_p5, %p799_p4 }
   0xe   :  { %p802_p7 = pnand %p801_p6, %p795_p3 }
  0x10   :  { %805 = shalt.err (!%p802_p7)
}
  0x11   :  { %s879_s22 = smov 64   ;;  %s880_s23 = smov 4  }
  0x12   :  { %32 = dma.hbm_to_vmem [thread:$0]  %s998_s1, 4096, %s27_s13, [#allocation6], %s879_s22, %s879_s22, %s880_s23  }
  0x13   :  { %s881_s26 = smov [#allocation2]   ;;  %s882_s28 = smov [#allocation7]  }
  0x14   :  { %s17_s27 = sshll.u32 %s881_s26, 4  ;;  %s38_s29 = sshll.u32 %s882_s28, 4  ;;  %s18_s27 = int_to_ptr.vmem [resolvable:$true] %s17_s27  ;;  %s39_s29 = int_to_ptr.vmem [resolvable:$true] %s38_s29 }
  0x15   :  { %s806_s5 = scalar_lea.hbm %s997_s0, 128 }
  0x16   :  { %p807_p8 = scmp.ne.s32.totalorder %s997_s0, %s806_s5  ;;  %p810_p9 = scmp.lt.u32.totalorder %s806_s5, %s997_s0 }
  0x18   :  { %p812_p10 = pnand %p810_p9, %p807_p8 }
  0x1a   :  { %815 = shalt.err (!%p812_p10)
}
  0x1b   :  { %s816_s1 = scalar_lea.vmem %s18_s27, 128  ;;  %p821_p12 = scmp.lt.s32.totalorder %s18_s27, %s18_s27 }
  0x1c   :  { %p817_p11 = scmp.ne.s32.totalorder %s18_s27, %s816_s1  ;;  %p822_p13 = scmp.lt.s32.totalorder %s816_s1, %s816_s1 }
  0x1e   :  { %p823_p0 = por %p822_p13, %p821_p12 }
  0x20   :  { %p824_p1 = pnand %p823_p0, %p817_p11 }
  0x22   :  { %827 = shalt.err (!%p824_p1)
}
  0x23   :  { %20 = dma.hbm_to_vmem [thread:$0]  %s997_s0, 128, %s18_s27, [#allocation3]  }
  0x24   :  { %s828_s14 = scalar_lea.hbm %s999_s2, 256 }
  0x25   :  { %p829_p2 = scmp.ne.s32.totalorder %s999_s2, %s828_s14  ;;  %p832_p3 = scmp.lt.u32.totalorder %s828_s14, %s999_s2 }
  0x27   :  { %p834_p4 = pnand %p832_p3, %p829_p2 }
  0x29   :  { %837 = shalt.err (!%p834_p4)
}
  0x2a   :  { %s838_s19 = scalar_lea.vmem %s39_s29, 256  ;;  %p843_p6 = scmp.lt.s32.totalorder %s39_s29, %s39_s29 }
  0x2b   :  { %p839_p5 = scmp.ne.s32.totalorder %s39_s29, %s838_s19  ;;  %p844_p7 = scmp.lt.s32.totalorder %s838_s19, %s838_s19 }
  0x2d   :  { %p845_p8 = por %p844_p7, %p843_p6 }
  0x2f   :  { %p846_p9 = pnand %p845_p8, %p839_p5 }
  0x31   :  { %849 = shalt.err (!%p846_p9)
}
  0x32   :  { %s883_s0 = smov 128   ;;  %s884_s20 = smov 8  }
  0x33   :  { %44 = dma.hbm_to_vmem [thread:$0]  %s999_s2, 256, %s39_s29, [#allocation6], %s883_s0, %s883_s0, %s884_s20  }
  0x34   :  { %872 = dma.done.wait [#allocation3], 128  }
  0x35   :  { %873 = vsyncadd [#allocation3], 4294967168 }
  0x36   :  { %874 = dma.done.wait [#allocation6], 4352  }
  0x37   :  { %875 = vsyncadd [#allocation6], 4294962944  ;;  %v885_v0 = vmov 0.0   ;;  %vm886_vm0 = vmmov 0   ;;  %v748_v1 = vld [vmem:[#allocation5] sm:$0xff]   ;;  %v749_v2 = vld [vmem:[#allocation5 + $0x8] sm:$0xff]   ;;  %v314_v57 = vlaneseq }
  0x38   :  { %657 = vmatprep.subr.bf16.mxu0 %v885_v0  ;;  %673 = vmatprep.mubr.msk.bf16.mxu0 %vm886_vm0, %v885_v0  ;;  %v750_v3 = vld [vmem:[#allocation5 + $0x10] sm:$0xff]   ;;  %v756_v4 = vld [vmem:[#allocation5 + $0x40] sm:$0xff]   ;;  %v751_v5 = vld [vmem:[#allocation5 + $0x18] sm:$0xff]   ;;  %v887_v63 = vmov 0   ;;  %s888_s2 = smov [#allocation8]  }
  0x39   :  { %677 = vmatprep.subr.bf16.mxu1 %v885_v0  ;;  %693 = vmatprep.mubr.msk.bf16.mxu1 %vm886_vm0, %v885_v0  ;;  %v757_v6 = vld [vmem:[#allocation5 + $0x48] sm:$0xff]   ;;  %v752_v7 = vld [vmem:[#allocation5 + $0x20] sm:$0xff]   ;;  %v758_v8 = vld [vmem:[#allocation5 + $0x50] sm:$0xff]   ;;  %v315_v61 = vshrl.u32 %v314_v57, 7  ;;  %s569_s23 = sshll.u32 %s888_s2, 4  ;;  %s570_s23 = int_to_ptr.vmem [resolvable:$true] %s569_s23 }
  0x3a   :  { %658 = vmatpush3.bf16.msra.mxu0 %v748_v1  ;;  %678 = vmatpush3.bf16.msra.mxu1 %v756_v4  ;;  %v753_v9 = vld [vmem:[#allocation5 + $0x28] sm:$0xff]   ;;  %v759_v10 = vld [vmem:[#allocation5 + $0x58] sm:$0xff]   ;;  %v754_v11 = vld [vmem:[#allocation5 + $0x30] sm:$0xff]   ;;  %s850_s24 = scalar_lea.vmem %s570_s23, 128  ;;  %p855_p11 = scmp.lt.s32.totalorder %s570_s23, %s570_s23 }
  0x3b   :  { %659 = vmatprep.subr.bf16.mxu0 %v885_v0  ;;  %679 = vmatprep.subr.bf16.mxu1 %v885_v0  ;;  %v760_v12 = vld [vmem:[#allocation5 + $0x60] sm:$0xff]   ;;  %v755_v13 = vld [vmem:[#allocation5 + $0x38] sm:$0xff]   ;;  %v761_v16 = vld [vmem:[#allocation5 + $0x68] sm:$0xff]   ;;  %v316_v62 = vsub.s32 0, %v315_v61  ;;  %p851_p10 = scmp.ne.s32.totalorder %s570_s23, %s850_s24  ;;  %p856_p12 = scmp.lt.s32.totalorder %s850_s24, %s850_s24 }
  0x3c   :  { %v55_v14 = vld [vmem:[#allocation2] sm:$0xff]  ;;  %v762_v17 = vld [vmem:[#allocation5 + $0x70] sm:$0xff]   ;;  %v579_v19 = vld [vmem:[#allocation7] ss:$0 sm:$0xff] }
  0x3d   :  { %v56_v15 = vpack.c.bf16 %v55_v14, %v55_v14  ;;  %v763_v18 = vld [vmem:[#allocation5 + $0x78] sm:$0xff]   ;;  %v588_v21 = vld [vmem:[#allocation7 + $0x1] ss:$0 sm:$0xff]  ;;  %v589_v24 = vld [vmem:[#allocation7 + $0x2] ss:$0 sm:$0xff]  ;;  %p857_p13 = por %p856_p12, %p855_p11 }
  0x3e   :  { %660 = vmatpush3.bf16.msra.mxu0 %v749_v2  ;;  %680 = vmatpush3.bf16.msra.mxu1 %v757_v6  ;;  %v764_v31 = vld [vmem:[#allocation5 + $0x80] sm:$0xff]   ;;  %v765_v32 = vld [vmem:[#allocation5 + $0x88] sm:$0xff]   ;;  %v766_v33 = vld [vmem:[#allocation5 + $0x90] sm:$0xff]  }
  0x3f   :  { %661 = vmatprep.subr.bf16.mxu0 %v885_v0  ;;  %681 = vmatprep.subr.bf16.mxu1 %v885_v0  ;;  %v767_v34 = vld [vmem:[#allocation5 + $0x98] sm:$0xff]   ;;  %v768_v35 = vld [vmem:[#allocation5 + $0xa0] sm:$0xff]   ;;  %v769_v36 = vld [vmem:[#allocation5 + $0xa8] sm:$0xff]   ;;  %p858_p0 = pnand %p857_p13, %p851_p10 }
  0x40   :  { %v770_v37 = vld [vmem:[#allocation5 + $0xb0] sm:$0xff]   ;;  %v771_v38 = vld [vmem:[#allocation5 + $0xb8] sm:$0xff]   ;;  %v772_v39 = vld [vmem:[#allocation5 + $0xc0] sm:$0xff]  }
  0x41   :  { %v773_v40 = vld [vmem:[#allocation5 + $0xc8] sm:$0xff]   ;;  %v774_v41 = vld [vmem:[#allocation5 + $0xd0] sm:$0xff]   ;;  %v775_v42 = vld [vmem:[#allocation5 + $0xd8] sm:$0xff]  }
  0x42   :  { %662 = vmatpush3.bf16.msra.mxu0 %v750_v3  ;;  %682 = vmatpush3.bf16.msra.mxu1 %v758_v8  ;;  %v776_v43 = vld [vmem:[#allocation5 + $0xe0] sm:$0xff]  }
  0x43   :  { %663 = vmatprep.subr.bf16.mxu0 %v885_v0  ;;  %683 = vmatprep.subr.bf16.mxu1 %v885_v0  ;;  %v590_v44 = vld [vmem:[#allocation7 + $0x3] ss:$0 sm:$0xff]  ;;  %v599_v46 = vld [vmem:[#allocation7 + $0x4] ss:$0 sm:$0xff]  ;;  %v600_v49 = vld [vmem:[#allocation7 + $0x5] ss:$0 sm:$0xff] }
  0x44   :  { %v301_v60 = vld [vmem:[#allocation7 + $0x6] sm:$0x1] }
  0x45   :  { %vm302_vm1 = vcmp.gt.f32.partialorder %v301_v60, 0.5 }
  0x46   :  { %664 = vmatpush3.bf16.msra.mxu0 %v751_v5  ;;  %684 = vmatpush3.bf16.msra.mxu1 %v759_v10  ;;  %v313_v1 = vsel %vm302_vm1, 1, %v887_v63  ;;  %v778_v10 = vld [vmem:[#allocation5 + $0xf0] sm:$0xff]  }
  0x47   :  { %665 = vmatprep.subr.bf16.mxu0 %v885_v0  ;;  %685 = vmatprep.subr.bf16.mxu1 %v885_v0  ;;  %v317_v2 = vrot.slane %v313_v1, %v316_v62 }
  0x49   :  { %vm318_vm2 = vcmp.eq.s32.totalorder %v317_v2, 1 }
  0x4a   :  { %666 = vmatpush3.bf16.msra.mxu0 %v752_v7  ;;  %686 = vmatpush3.bf16.msra.mxu1 %v760_v12  ;;  %v442_v12 = vld [vmem:[#allocation7 + $0xa] sm:$0x1] }
  0x4b   :  { %667 = vmatprep.subr.bf16.mxu0 %v885_v0  ;;  %687 = vmatprep.subr.bf16.mxu1 %v885_v0  ;;  %vm443_vm4 = vcmp.gt.f32.partialorder %v442_v12, 0.5 }
  0x4c   :  { %v445_v14 = vsel %vm443_vm4, 1, %v887_v63 }
  0x4e   :  { %668 = vmatpush3.bf16.msra.mxu0 %v753_v9  ;;  %688 = vmatpush3.bf16.msra.mxu1 %v761_v16  ;;  %v777_v9 = vld [vmem:[#allocation5 + $0xe8] sm:$0xff]  }
  0x4f   :  { %669 = vmatprep.subr.bf16.mxu0 %v885_v0  ;;  %689 = vmatprep.subr.bf16.mxu1 %v885_v0  ;;  %v610_v16 = vld [vmem:[#allocation7 + $0x8] ss:$0 sm:$0xff] }
  0x52   :  { %670 = vmatpush3.bf16.msra.mxu0 %v754_v11  ;;  %690 = vmatpush3.bf16.msra.mxu1 %v762_v17  ;;  %v779_v11 = vld [vmem:[#allocation5 + $0xf8] sm:$0xff]  }
  0x53   :  { %671 = vmatprep.subr.bf16.mxu0 %v885_v0  ;;  %691 = vmatprep.subr.bf16.mxu1 %v885_v0 }
  0x56   :  { %672 = vmatpush3.bf16.msra.mxu0 %v755_v13  ;;  %692 = vmatpush3.bf16.msra.mxu1 %v763_v18  ;;  %v601_v13 = vld [vmem:[#allocation7 + $0x7] ss:$0 sm:$0xff] }
  0x57   :  { %697 = vmatprep.subr.bf16.mxu0 %v885_v0  ;;  %717 = vmatprep.subr.bf16.mxu1 %v885_v0 }
  0x59   :  { %674 = vmatmul.mubr.bf16.vlgmr.msra.gmra.mrb[0].mxu0 %v56_v15 }
  0x5a   :  { %713 = vmatprep.mubr.msk.bf16.mxu0 %vm886_vm0, %v885_v0  ;;  %698 = vmatpush3.bf16.msra.mxu0 %v764_v31 }
  0x5b   :  { %699 = vmatprep.subr.bf16.mxu0 %v885_v0 }
  0x5e   :  { %700 = vmatpush3.bf16.msra.mxu0 %v765_v32 }
  0x5f   :  { %701 = vmatprep.subr.bf16.mxu0 %v885_v0 }
  0x62   :  { %702 = vmatpush3.bf16.msra.mxu0 %v766_v33 }
  0x63   :  { %703 = vmatprep.subr.bf16.mxu0 %v885_v0 }
  0x66   :  { %704 = vmatpush3.bf16.msra.mxu0 %v767_v34 }
  0x67   :  { %705 = vmatprep.subr.bf16.mxu0 %v885_v0 }
  0x6a   :  { %706 = vmatpush3.bf16.msra.mxu0 %v768_v35 }
  0x6b   :  { %707 = vmatprep.subr.bf16.mxu0 %v885_v0 }
  0x6e   :  { %708 = vmatpush3.bf16.msra.mxu0 %v769_v36 }
  0x6f   :  { %709 = vmatprep.subr.bf16.mxu0 %v885_v0 }
  0x72   :  { %710 = vmatpush3.bf16.msra.mxu0 %v770_v37 }
  0x73   :  { %711 = vmatprep.subr.bf16.mxu0 %v885_v0 }
  0x76   :  { %712 = vmatpush3.bf16.msra.mxu0 %v771_v38 }
 0x12c   :  { %v160_v20 = vpop.f32.mrb[0].mxu0 }
 0x12d   :  { %v161_v22 = vadd.f32 %v579_v19, %v160_v20  ;;  %v675_v23 = vpop.f32.mrb[1].mxu0  ;;  %v611_v19 = vld [vmem:[#allocation7 + $0x9] ss:$0 sm:$0xff] }
 0x12e   :  { %v163_v25 = vpop.f32.mrb[2].mxu0 }
 0x12f   :  { %v171_v26 = vmul.f32 %v588_v21, %v161_v22  ;;  %v676_v27 = vpop.f32.mrb[3].mxu0  ;;  %v449_v21 = vrot.slane %v445_v14, %v316_v62 }
 0x130   :  { %v612_v27 = vld [vmem:[#allocation7 + $0xb] ss:$0 sm:$0xff] }
 0x131   :  { %v177_v28 = vadd.f32 %v589_v24, %v171_v26  ;;  %vm450_vm5 = vcmp.eq.s32.totalorder %v449_v21, 1 }
 0x133   :  { %v178_v29 = vmax.f32 %v177_v28, 0.0 }
 0x135   :  { %v179_v30 = vpack.c.bf16 %v178_v29, %v178_v29 }
 0x137   :  { %694 = vmatmul.mubr.bf16.vlgmr.msra.gmra.mrb[0].mxu1 %v179_v30 }
 0x138   :  { %733 = vmatprep.mubr.msk.bf16.mxu1 %vm886_vm0, %v885_v0  ;;  %718 = vmatpush3.bf16.msra.mxu1 %v772_v39 }
 0x139   :  { %719 = vmatprep.subr.bf16.mxu1 %v885_v0 }
 0x13c   :  { %720 = vmatpush3.bf16.msra.mxu1 %v773_v40 }
 0x13d   :  { %721 = vmatprep.subr.bf16.mxu1 %v885_v0 }
 0x140   :  { %722 = vmatpush3.bf16.msra.mxu1 %v774_v41 }
 0x141   :  { %723 = vmatprep.subr.bf16.mxu1 %v885_v0 }
 0x144   :  { %724 = vmatpush3.bf16.msra.mxu1 %v775_v42 }
 0x145   :  { %725 = vmatprep.subr.bf16.mxu1 %v885_v0 }
 0x148   :  { %726 = vmatpush3.bf16.msra.mxu1 %v776_v43 }
 0x149   :  { %727 = vmatprep.subr.bf16.mxu1 %v885_v0 }
 0x14c   :  { %728 = vmatpush3.bf16.msra.mxu1 %v777_v9 }
 0x14d   :  { %729 = vmatprep.subr.bf16.mxu1 %v885_v0 }
 0x150   :  { %730 = vmatpush3.bf16.msra.mxu1 %v778_v10 }
 0x151   :  { %731 = vmatprep.subr.bf16.mxu1 %v885_v0 }
 0x154   :  { %732 = vmatpush3.bf16.msra.mxu1 %v779_v11 }
 0x20a   :  { %v283_v45 = vpop.f32.mrb[0].mxu1 }
 0x20b   :  { %v284_v47 = vadd.f32 %v590_v44, %v283_v45  ;;  %v695_v48 = vpop.f32.mrb[1].mxu1 }
 0x20c   :  { %v286_v50 = vpop.f32.mrb[2].mxu1 }
 0x20d   :  { %v294_v51 = vmul.f32 %v599_v46, %v284_v47  ;;  %v696_v52 = vpop.f32.mrb[3].mxu1 }
 0x20f   :  { %v300_v53 = vadd.f32 %v600_v49, %v294_v51 }
 0x211   :  { %v303_v54 = vand.u32 2147483647, %v300_v53  ;;  %vm309_vm3 = vcmp.ge.f32.partialorder %v300_v53, 0.0  ;;  %v312_v5 = vmax.f32 %v300_v53, 0.0 }
 0x213   :  { %v304_v55 = vsub.f32 0.0, %v303_v54 }
 0x215   :  { %v305_v56 = vmul.f32 1.442695, %v304_v55 }
 0x217   :  { %780 = vpow2.f32 %v305_v56 }
 0x221   :  { %v781_v58 = vpop.eup %780 }
 0x222   :  { %v307_v59 = vadd.f32 1.0, %v781_v58 }
 0x224   :  { %782 = vrcp.f32 %v307_v59 }
 0x22e   :  { %v783_v3 = vpop.eup %782 }
 0x22f   :  { %v310_v4 = vsub.f32 1.0, %v783_v3 }
 0x231   :  { %v311_v6 = vsel %vm309_vm3, %v783_v3, %v310_v4 }
 0x232   :  { %v319_v7 = vsel %vm318_vm2, %v311_v6, %v312_v5 }
 0x233   :  { %v320_v8 = vpack.c.bf16 %v319_v7, %v319_v7 }
 0x235   :  { %714 = vmatmul.mubr.bf16.vlgmr.msra.gmra.mrb[4].mxu0 %v320_v8 }
 0x308   :  { %v424_v15 = vpop.f32.mrb[4].mxu0 }
 0x309   :  { %v425_v17 = vadd.f32 %v601_v13, %v424_v15  ;;  %v715_v18 = vpop.f32.mrb[5].mxu0 }
 0x30a   :  { %v427_v20 = vpop.f32.mrb[6].mxu0 }
 0x30b   :  { %v435_v22 = vmul.f32 %v610_v16, %v425_v17  ;;  %v716_v23 = vpop.f32.mrb[7].mxu0 }
 0x30d   :  { %v441_v24 = vadd.f32 %v611_v19, %v435_v22 }
 0x30f   :  { %v444_v25 = vmax.f32 %v441_v24, 0.0 }
 0x311   :  { %v451_v26 = vsel %vm450_vm5, %v444_v25, %v441_v24 }
 0x312   :  { %v452_v0 = vpack.c.bf16 %v451_v26, %v451_v26 }
 0x314   :  { %734 = vmatmul.mubr.bf16.vlgmr.msra.gmra.mrb[4].mxu1 %v452_v0 }
 0x3e7   :  { %v556_v28 = vpop.f32.mrb[4].mxu1 }
 0x3e8   :  { %v557_v29 = vadd.f32 %v612_v27, %v556_v28  ;;  %v735_v30 = vpop.f32.mrb[5].mxu1 }
 0x3e9   :  { %v559_v31 = vpop.f32.mrb[6].mxu1 }
 0x3ea   :  { %562 = vst [vmem:[#allocation8] sm:$0xff] %v557_v29  ;;  %v736_v32 = vpop.f32.mrb[7].mxu1 }
 0x3eb   :  { %861 = shalt.err (!%p858_p0)
}
 0x3ec   :  { %s862_s27 = scalar_lea.hbm %s1000_s3, 128 }
 0x3ed   :  { %p863_p1 = scmp.ne.s32.totalorder %s1000_s3, %s862_s27  ;;  %p866_p2 = scmp.lt.u32.totalorder %s862_s27, %s1000_s3 }
 0x3ef   :  { %p868_p3 = pnand %p866_p2, %p863_p1 }
 0x3f1   :  { %871 = shalt.err (!%p868_p3)
}
 0x3f2   :  { %572 = dma.vmem_to_hbm [thread:$0]  %s570_s23, 128, %s1000_s3, [#allocation4]  }
 0x3f3   :  { %876 = dma.done.wait [#allocation4], 128  }
 0x3f4   :  { %877 = vsyncadd [#allocation4], 4294967168 }
 0x3f5   :  { %576 = vsyncpa [#allocation3], 1 }
 0x3f6   :  { %577 = vsyncpa [#allocation6], 1 }
 0x3f7   :  { %578 = vsyncpa [#allocation4], 1 }

</bundles_post_ra>
